<compile_context>
chip_gen: v5e
topology: v5e:2x2
jax: 0.10.0
libtpu: 0.0.40
codegen_flags: <defaults>
</compile_context>

<pallas_src>
import jax
import jax.numpy as jnp
from jax.experimental import pallas as pl
from jax.experimental.pallas import tpu as pltpu

HIDDEN = 64
LANE = 128


def dqn_kernel(x_ref, w1_ref, b1_ref, w2_ref, b2_ref, w3_ref, b3_ref, o_ref):
    # fc1 + relu : bf16 matmul operands, f32 accumulation + f32 elementwise.
    h1 = jnp.dot(x_ref[...], w1_ref[...], preferred_element_type=jnp.float32)
    h1 = jnp.maximum(h1 + b1_ref[...], 0.0)
    # fc2 + relu
    h2 = jnp.dot(h1.astype(jnp.bfloat16), w2_ref[...],
                 preferred_element_type=jnp.float32)
    h2 = jnp.maximum(h2 + b2_ref[...], 0.0)
    # fc3 (no activation) -> lane-dense (padded to 128 cols) output block
    out = jnp.dot(h2.astype(jnp.bfloat16), w3_ref[...],
                  preferred_element_type=jnp.float32)
    o_ref[...] = (out + b3_ref[...]).astype(o_ref.dtype)


def _round_up(v, m):
    return (v + m - 1) // m * m


def dqn_forward(x, params, *, b_tile=256):
    """x: (B, input_size) float32. params: dict of w1,b1,w2,b2,w3,b3."""
    w1, b1, w2, b2, w3, b3 = (params["w1"], params["b1"], params["w2"],
                              params["b2"], params["w3"], params["b3"])
    B, in_size = x.shape
    out_size = w3.shape[1]

    # Lane-dense output: zero-pad fc3's output dim to a multiple of 128 so the
    # output stores are full-width vst's, then slice the real columns off after.
    out_pad = _round_up(out_size, LANE)
    w3p = jnp.pad(w3, ((0, 0), (0, out_pad - out_size)))
    b3p = jnp.pad(b3, ((0, 0), (0, out_pad - out_size)))

    # Batch tiling: row tile is a multiple of 8, capped at b_tile (<=256 keeps
    # the (bt, 64) f32 intermediates inside the vreg budget, no spills).
    bt = min(b_tile, _round_up(B, 8))
    B_pad = _round_up(B, bt)
    xp = x if B_pad == B else jnp.pad(x, ((0, B_pad - B), (0, 0)))

    # bf16 MXU operands; biases and accumulation stay f32.
    xp = xp.astype(jnp.bfloat16)
    w1b, w2b, w3b = (w.astype(jnp.bfloat16) for w in (w1, w2, w3p))
    b1f, b2f, b3f = (b.astype(jnp.float32) for b in (b1, b2, b3p))

    # Weights/biases: same block every grid step -> stay resident in VMEM.
    pinned = lambda shape: pl.BlockSpec(shape, lambda i: tuple(0 for _ in shape))

    out = pl.pallas_call(
        dqn_kernel,
        out_shape=jax.ShapeDtypeStruct((B_pad, out_pad), jnp.float32),
        grid=(B_pad // bt,),
        in_specs=[
            pl.BlockSpec((bt, in_size), lambda i: (i, 0)),  # x streamed over rows
            pinned(w1b.shape), pinned(b1f.shape),
            pinned(w2b.shape), pinned(b2f.shape),
            pinned(w3b.shape), pinned(b3f.shape),
        ],
        out_specs=pl.BlockSpec((bt, out_pad), lambda i: (i, 0)),
        compiler_params=pltpu.CompilerParams(
            dimension_semantics=("parallel",)),   # shard batch axis across TCs (v7x)
    )(xp, w1b, b1f, w2b, b2f, w3b, b3f)

    return out[:B, :out_size]


def init_params(key, input_size, output_size, hidden=HIDDEN):
    """PyTorch-like uniform(-1/sqrt(fan_in), 1/sqrt(fan_in)) init."""
    keys = jax.random.split(key, 6)

    def lin(kw, kb, fan_in, fan_out):
        bound = 1.0 / jnp.sqrt(fan_in)
        w = jax.random.uniform(kw, (fan_in, fan_out), jnp.float32, -bound, bound)
        b = jax.random.uniform(kb, (1, fan_out), jnp.float32, -bound, bound)
        return w, b

    w1, b1 = lin(keys[0], keys[1], input_size, hidden)
    w2, b2 = lin(keys[2], keys[3], hidden, hidden)
    w3, b3 = lin(keys[4], keys[5], hidden, output_size)
    return {"w1": w1, "b1": b1, "w2": w2, "b2": b2, "w3": w3, "b3": b3}


def dqn_reference(x, p, matmul_dtype=jnp.float32):
    c = lambda a: a.astype(matmul_dtype)
    h1 = jnp.maximum(
        jnp.dot(c(x), c(p["w1"]), preferred_element_type=jnp.float32) + p["b1"], 0.0)
    h2 = jnp.maximum(
        jnp.dot(c(h1), c(p["w2"]), preferred_element_type=jnp.float32) + p["b2"], 0.0)
    return jnp.dot(c(h2), c(p["w3"]), preferred_element_type=jnp.float32) + p["b3"]


if __name__ == "__main__":
    key = jax.random.PRNGKey(0)
    k_x, k_p, k_xl = jax.random.split(key, 3)

    batch = 2
    input_size = 8     # small state vector
    output_size = 4    # number of discrete actions

    params = init_params(k_p, input_size, output_size)

    # Small-shape run (single grid step).
    x = jax.random.normal(k_x, (batch, input_size), dtype=jnp.float32)
    out = jax.block_until_ready(dqn_forward(x, params))
    assert out.shape == (batch, output_size)
    ref_bf16 = dqn_reference(x, params, jnp.bfloat16)   # same bf16-MXU numerics
    ref_f32 = dqn_reference(x, params, jnp.float32)
    assert jnp.allclose(out, ref_bf16, atol=1e-3, rtol=1e-3), "mismatch vs bf16 reference"
    assert jnp.allclose(out, ref_f32, atol=5e-2, rtol=5e-2), "mismatch vs f32 reference"

    # Larger batch exercises the tiled (parallel) grid path.
    xl = jax.random.normal(k_xl, (512, input_size), dtype=jnp.float32)
    outl = jax.block_until_ready(dqn_forward(xl, params))
    refl = dqn_reference(xl, params, jnp.bfloat16)
    assert outl.shape == (512, output_size)
    assert jnp.allclose(outl, refl, atol=1e-3, rtol=1e-3), "mismatch vs bf16 reference (B=512)"

    print("KERNEL_OK")
</pallas_src>

<mosaic_0001>
module attributes {stable_mosaic.version = 11 : i64} {
  func.func @dqn_kernel(%arg0: i32, %arg1: memref<8x8xbf16, #tpu.memory_space<vmem>>, %arg2: memref<8x64xbf16, #tpu.memory_space<vmem>>, %arg3: memref<1x64xf32, #tpu.memory_space<vmem>>, %arg4: memref<64x64xbf16, #tpu.memory_space<vmem>>, %arg5: memref<1x64xf32, #tpu.memory_space<vmem>>, %arg6: memref<64x128xbf16, #tpu.memory_space<vmem>>, %arg7: memref<1x128xf32, #tpu.memory_space<vmem>>, %arg8: memref<8x128xf32, #tpu.memory_space<vmem>>) attributes {dimension_semantics = [#tpu.dimension_semantics<parallel>], iteration_bounds = array<i64: 1>, scalar_prefetch = 0 : i64, scratch_operands = 0 : i64, tpu.core_type = #tpu.core_type<tc>, window_params = [{transform_indices = @transform_0, window_bounds = array<i64: 8, 8>}, {pipeline_mode = #tpu.pipeline_mode<synchronous>, transform_indices = @transform_1, window_bounds = array<i64: 8, 64>}, {pipeline_mode = #tpu.pipeline_mode<synchronous>, transform_indices = @transform_2, window_bounds = array<i64: 1, 64>}, {pipeline_mode = #tpu.pipeline_mode<synchronous>, transform_indices = @transform_3, window_bounds = array<i64: 64, 64>}, {pipeline_mode = #tpu.pipeline_mode<synchronous>, transform_indices = @transform_4, window_bounds = array<i64: 1, 64>}, {pipeline_mode = #tpu.pipeline_mode<synchronous>, transform_indices = @transform_5, window_bounds = array<i64: 64, 128>}, {pipeline_mode = #tpu.pipeline_mode<synchronous>, transform_indices = @transform_6, window_bounds = array<i64: 1, 128>}, {transform_indices = @transform_7, window_bounds = array<i64: 8, 128>}]} {
    %c0 = arith.constant 0 : index
    %c0_0 = arith.constant 0 : index
    %0 = vector.load %arg1[%c0, %c0_0] : memref<8x8xbf16, #tpu.memory_space<vmem>>, vector<8x8xbf16>
    %c0_1 = arith.constant 0 : index
    %c0_2 = arith.constant 0 : index
    %1 = vector.load %arg2[%c0_1, %c0_2] : memref<8x64xbf16, #tpu.memory_space<vmem>>, vector<8x64xbf16>
    %cst = arith.constant dense<0.000000e+00> : vector<8x64xf32>
    %2 = tpu.matmul %0, %1, %cst {dimension_numbers = #tpu.dot_dimension_numbers<[1], [0], [0], [1], [0, 0, 1, 1], [], []>} : vector<8x8xbf16>, vector<8x64xbf16>, vector<8x64xf32> -> vector<8x64xf32>
    %c0_3 = arith.constant 0 : index
    %c0_4 = arith.constant 0 : index
    %3 = vector.load %arg3[%c0_3, %c0_4] : memref<1x64xf32, #tpu.memory_space<vmem>>, vector<1x64xf32>
    %4 = vector.broadcast %3 : vector<1x64xf32> to vector<8x64xf32>
    %5 = arith.addf %2, %4 : vector<8x64xf32>
    %cst_5 = arith.constant 0.000000e+00 : f32
    %6 = vector.broadcast %cst_5 : f32 to vector<8x64xf32>
    %7 = arith.maximumf %5, %6 : vector<8x64xf32>
    %8 = arith.truncf %7 : vector<8x64xf32> to vector<8x64xbf16>
    %c0_6 = arith.constant 0 : index
    %c0_7 = arith.constant 0 : index
    %9 = vector.load %arg4[%c0_6, %c0_7] : memref<64x64xbf16, #tpu.memory_space<vmem>>, vector<64x64xbf16>
    %cst_8 = arith.constant dense<0.000000e+00> : vector<8x64xf32>
    %10 = tpu.matmul %8, %9, %cst_8 {dimension_numbers = #tpu.dot_dimension_numbers<[1], [0], [0], [1], [0, 0, 1, 1], [], []>} : vector<8x64xbf16>, vector<64x64xbf16>, vector<8x64xf32> -> vector<8x64xf32>
    %c0_9 = arith.constant 0 : index
    %c0_10 = arith.constant 0 : index
    %11 = vector.load %arg5[%c0_9, %c0_10] : memref<1x64xf32, #tpu.memory_space<vmem>>, vector<1x64xf32>
    %12 = vector.broadcast %11 : vector<1x64xf32> to vector<8x64xf32>
    %13 = arith.addf %10, %12 : vector<8x64xf32>
    %cst_11 = arith.constant 0.000000e+00 : f32
    %14 = vector.broadcast %cst_11 : f32 to vector<8x64xf32>
    %15 = arith.maximumf %13, %14 : vector<8x64xf32>
    %16 = arith.truncf %15 : vector<8x64xf32> to vector<8x64xbf16>
    %c0_12 = arith.constant 0 : index
    %c0_13 = arith.constant 0 : index
    %17 = vector.load %arg6[%c0_12, %c0_13] : memref<64x128xbf16, #tpu.memory_space<vmem>>, vector<64x128xbf16>
    %cst_14 = arith.constant dense<0.000000e+00> : vector<8x128xf32>
    %18 = tpu.matmul %16, %17, %cst_14 {dimension_numbers = #tpu.dot_dimension_numbers<[1], [0], [0], [1], [0, 0, 1, 1], [], []>} : vector<8x64xbf16>, vector<64x128xbf16>, vector<8x128xf32> -> vector<8x128xf32>
    %c0_15 = arith.constant 0 : index
    %c0_16 = arith.constant 0 : index
    %19 = vector.load %arg7[%c0_15, %c0_16] : memref<1x128xf32, #tpu.memory_space<vmem>>, vector<1x128xf32>
    %20 = vector.broadcast %19 : vector<1x128xf32> to vector<8x128xf32>
    %21 = arith.addf %18, %20 : vector<8x128xf32>
    %c0_17 = arith.constant 0 : index
    %c0_18 = arith.constant 0 : index
    %22 = vector.load %arg8[%c0_17, %c0_18] : memref<8x128xf32, #tpu.memory_space<vmem>>, vector<8x128xf32>
    tpu.vector_store %arg8[%c0_17, %c0_18], %21 {strides = array<i32>} : memref<8x128xf32, #tpu.memory_space<vmem>>, vector<8x128xf32>,
    return
  }
  func.func @transform_0(%arg0: i32) -> (i32, i32) {
    %c0_i32 = arith.constant 0 : i32
    %c0_i32_0 = arith.constant 0 : i32
    return %arg0, %c0_i32 : i32, i32
  }
  func.func @transform_1(%arg0: i32) -> (i32, i32) {
    %c0_i32 = arith.constant 0 : i32
    %c0_i32_0 = arith.constant 0 : i32
    %c0_i32_1 = arith.constant 0 : i32
    return %c0_i32, %c0_i32_0 : i32, i32
  }
  func.func @transform_2(%arg0: i32) -> (i32, i32) {
    %c0_i32 = arith.constant 0 : i32
    %c0_i32_0 = arith.constant 0 : i32
    %c0_i32_1 = arith.constant 0 : i32
    return %c0_i32, %c0_i32_0 : i32, i32
  }
  func.func @transform_3(%arg0: i32) -> (i32, i32) {
    %c0_i32 = arith.constant 0 : i32
    %c0_i32_0 = arith.constant 0 : i32
    %c0_i32_1 = arith.constant 0 : i32
    return %c0_i32, %c0_i32_0 : i32, i32
  }
  func.func @transform_4(%arg0: i32) -> (i32, i32) {
    %c0_i32 = arith.constant 0 : i32
    %c0_i32_0 = arith.constant 0 : i32
    %c0_i32_1 = arith.constant 0 : i32
    return %c0_i32, %c0_i32_0 : i32, i32
  }
  func.func @transform_5(%arg0: i32) -> (i32, i32) {
    %c0_i32 = arith.constant 0 : i32
    %c0_i32_0 = arith.constant 0 : i32
    %c0_i32_1 = arith.constant 0 : i32
    return %c0_i32, %c0_i32_0 : i32, i32
  }
  func.func @transform_6(%arg0: i32) -> (i32, i32) {
    %c0_i32 = arith.constant 0 : i32
    %c0_i32_0 = arith.constant 0 : i32
    %c0_i32_1 = arith.constant 0 : i32
    return %c0_i32, %c0_i32_0 : i32, i32
  }
  func.func @transform_7(%arg0: i32) -> (i32, i32) {
    %c0_i32 = arith.constant 0 : i32
    %c0_i32_0 = arith.constant 0 : i32
    return %arg0, %c0_i32 : i32, i32
  }
}

</mosaic_0001>

<bundles_post_ra>
// kernel: tpu_custom_call.1
= control target key start
LH: loop header
LB: loop body
LE: loop exit
PB: predicated region body
PF: predicated region fallthrough
CT: control target
= control target key end

     0   :  { %12 = vsyncpa [#allocation3], 0  ;;  %s495_s0 = inlined_call_operand.hbm [shape: bf16[8,8], index: 0, kind: input, shape index: {}]   ;;  %s496_s1 = inlined_call_operand.hbm [shape: bf16[8,64], index: 1, kind: input, shape index: {}]   ;;  %s497_s2 = inlined_call_operand.vmem [shape: f32[1,64], index: 2, kind: input, shape index: {}]   ;;  %s498_s3 = inlined_call_operand.hbm [shape: bf16[64,64], index: 3, kind: input, shape index: {}]   ;;  %s499_s4 = inlined_call_operand.vmem [shape: f32[1,64], index: 4, kind: input, shape index: {}]   ;;  %s500_s5 = inlined_call_operand.hbm [shape: bf16[64,128], index: 5, kind: input, shape index: {}]   ;;  %s501_s6 = inlined_call_operand.vmem [shape: f32[1,128], index: 6, kind: input, shape index: {}]   ;;  %s502_s7 = inlined_call_operand.hbm [shape: f32[8,128], index: 7, kind: output, shape index: {}]  }
   0x1   :  { %13 = vsyncpa [#allocation6], 0 }
   0x2   :  { %14 = vsyncpa [#allocation9], 0  ;;  %s32_s26 = sshll.u32 %s496_s1, 4  ;;  %s33_s26 = int_to_ptr.hbm [resolvable:$true] %s32_s26 }
   0x3   :  { %15 = vsyncpa [#allocation4], 0  ;;  %s424_s27 = smov [#allocation5]   ;;  %s21_s8 = sshll.u32 %s495_s0, 4  ;;  %s22_s8 = int_to_ptr.hbm [resolvable:$true] %s21_s8 }
   0x4   :  { %s34_s28 = sshll.u32 %s424_s27, 4  ;;  %s425_s9 = smov [#allocation2]   ;;  %s35_s28 = int_to_ptr.vmem [resolvable:$true] %s34_s28 }
   0x5   :  { %37 = dma.hbm_to_vmem [thread:$0]  %s33_s26, 64, %s35_s28, [#allocation6]  }
   0x6   :  { %s23_s10 = sshll.u32 %s425_s9, 4  ;;  %s44_s13 = sshll.u32 %s498_s3, 4  ;;  %s24_s10 = int_to_ptr.vmem [resolvable:$true] %s23_s10  ;;  %s45_s13 = int_to_ptr.hbm [resolvable:$true] %s44_s13 }
   0x7   :  { %26 = dma.hbm_to_vmem [thread:$0]  %s22_s8, 64, %s24_s10, [#allocation3]  }
   0x8   :  { %s426_s1 = smov [#allocation7]   ;;  %s59_s17 = sshll.u32 %s500_s5, 4  ;;  %s60_s17 = int_to_ptr.hbm [resolvable:$true] %s59_s17 }
   0x9   :  { %s46_s14 = sshll.u32 %s426_s1, 4  ;;  %s427_s18 = smov 64   ;;  %s47_s14 = int_to_ptr.vmem [resolvable:$true] %s46_s14 }
   0xa   :  { %s428_s0 = smov 4   ;;  %s429_s19 = smov [#allocation8]  }
   0xb   :  { %52 = dma.hbm_to_vmem [thread:$0]  %s45_s13, 512, %s47_s14, [#allocation6], %s427_s18, %s427_s18, %s428_s0  }
   0xc   :  { %s61_s20 = sshll.u32 %s429_s19, 4  ;;  %s62_s20 = int_to_ptr.vmem [resolvable:$true] %s61_s20 }
   0xd   :  { %67 = dma.hbm_to_vmem [thread:$0]  %s60_s17, 512, %s62_s20, [#allocation9], %s427_s18, %s427_s18, %s428_s0  }
   0xe   :  { %416 = dma.done.wait [#allocation3], 64  }
   0xf   :  { %417 = vsyncadd [#allocation3], 4294967232 }
  0x10   :  { %418 = dma.done.wait [#allocation6], 576  }
  0x11   :  { %419 = vsyncadd [#allocation6], 4294966720 }
  0x12   :  { %420 = dma.done.wait [#allocation9], 512  }
  0x13   :  { %421 = vsyncadd [#allocation9], 4294966784  ;;  %vm97_vm0 = vcmask 1043456   ;;  %v88_v0 = vld [vmem:[#allocation5] sm:$0xf]  ;;  %vm93_vm1 = vcmask 64512  }
  0x14   :  { %v281_v1 = vld [vmem:[#allocation7 + $0x18] sm:$0xff]  ;;  %v99_v2 = vsel %vm97_vm0, %v88_v0, 0  ;;  %v280_v4 = vld [vmem:[#allocation7 + $0x10] sm:$0xff]  ;;  %v279_v5 = vld [vmem:[#allocation7 + $0x8] sm:$0xff]  ;;  %vm152_vm2 = vcmask 523264   ;;  %s430_s24 = smov [#allocation10]  }
  0x15   :  { %v87_v3 = vld [vmem:[#allocation2] sm:$0xf]  ;;  %108 = vmatpush.bf16.msra.mxu0 %v99_v2  ;;  %160 = vmatpush.bf16.msra.mxu1 %v281_v1  ;;  %v278_v6 = vld [vmem:[#allocation7] sm:$0xff]  ;;  %v284_v8 = vld [vmem:[#allocation8 + $0x10] sm:$0xff]  ;;  %s229_s25 = sshll.u32 %s430_s24, 4  ;;  %s231_s28 = sshll.u32 %s502_s7, 4  ;;  %s230_s25 = int_to_ptr.vmem [resolvable:$true] %s229_s25  ;;  %s232_s28 = int_to_ptr.hbm [resolvable:$true] %s231_s28 }
  0x16   :  { %v285_v7 = vld [vmem:[#allocation8 + $0x18] sm:$0xff]  ;;  %v283_v15 = vld [vmem:[#allocation8 + $0x8] sm:$0xff]  ;;  %v282_v16 = vld [vmem:[#allocation8] sm:$0xff] }
  0x17   :  { %214 = vmatpush.bf16.msra.mxu2 %v285_v7  ;;  %v293_v9 = vld [vmem:[%s497_s2] ss:$0 sm:$0xff] }
  0x18   :  { %243 = vmatmul.msk.bf16.vlgmr.msra.gmra.mxu0 %vm93_vm1, %v87_v3  ;;  %v294_v17 = vld [vmem:[%s499_s4] ss:$0 sm:$0xff] }
  0x19   :  { %161 = vmatpush.bf16.msra.mxu1 %v280_v4  ;;  %v295_v23 = vld [vmem:[%s501_s6] ss:$0 sm:$0xff] }
  0x1b   :  { %215 = vmatpush.bf16.msra.mxu2 %v284_v8 }
  0x1d   :  { %162 = vmatpush.bf16.msra.mxu1 %v279_v5 }
  0x1f   :  { %216 = vmatpush.bf16.msra.mxu2 %v283_v15 }
  0x21   :  { %163 = vmatpush.bf16.msra.mxu1 %v278_v6 }
  0x23   :  { %217 = vmatpush.bf16.msra.mxu2 %v282_v16 }
  0x95   :  { %v110_v10 = vpop.f32.mrf.mxu0 }
  0x96   :  { %v111_v11 = vadd.f32 %v293_v9, %v110_v10 }
  0x98   :  { %v114_v12 = vmax.f32 %v111_v11, 0.0 }
  0x9a   :  { %v115_v13 = vpack.c.bf16 %v114_v12, %v114_v12 }
  0x9c   :  { %260 = vmatmul.msk.bf16.vlgmr.msra.gmra.mxu1 %vm152_vm2, %v115_v13 }
  0x9d   :  { %v112_v14 = vpop.f32.mrf.mxu0 }
 0x119   :  { %v165_v18 = vpop.f32.mrf.mxu1 }
 0x11a   :  { %v166_v19 = vadd.f32 %v294_v17, %v165_v18 }
 0x11c   :  { %v169_v20 = vmax.f32 %v166_v19, 0.0 }
 0x11e   :  { %v170_v21 = vpack.c.bf16 %v169_v20, %v169_v20 }
 0x120   :  { %277 = vmatmul.msk.bf16.vlgmr.msra.gmra.mxu2 %vm152_vm2, %v170_v21 }
 0x121   :  { %v167_v22 = vpop.f32.mrf.mxu1 }
 0x1a3   :  { %v219_v24 = vpop.f32.mrf.mxu2 }
 0x1a4   :  { %v220_v25 = vadd.f32 %v295_v23, %v219_v24 }
 0x1a6   :  { %223 = vst [vmem:[#allocation10] sm:$0xff] %v220_v25 }
 0x1a7   :  { %234 = dma.vmem_to_hbm [thread:$0]  %s230_s25, 128, %s232_s28, [#allocation4]  }
 0x1ab   :  { %v221_v26 = vpop.f32.mrf.mxu2 }
 0x1ac   :  { %422 = dma.done.wait [#allocation4], 128  }
 0x1ad   :  { %423 = vsyncadd [#allocation4], 4294967168 }
 0x1ae   :  { %239 = vsyncpa [#allocation3], 1 }
 0x1af   :  { %240 = vsyncpa [#allocation6], 1 }
 0x1b0   :  { %241 = vsyncpa [#allocation9], 1 }
 0x1b1   :  { %242 = vsyncpa [#allocation4], 1 }

</bundles_post_ra>
